<compile_context>
chip_gen: v7x
topology: tpu7x:2x2x1
jax: 0.10.0
libtpu: 0.0.40
codegen_flags: <defaults>
</compile_context>

<pallas_src>
import jax
import jax.numpy as jnp
from jax.experimental import pallas as pl
from jax.experimental.pallas import tpu as pltpu

TAU = 2.0
V_TH = 1.0
V_RESET = 0.0
BN_EPS = 1e-5

CONV_VMEM_LIMIT = 48 * 1024 * 1024   # budget against v7x's 64 MiB physical
FC_VMEM_LIMIT = 32 * 1024 * 1024


def _pick_row_tile(H):
    """Output-row tile: >=2 tiles when possible (megacore), bounded VMEM."""
    if H >= 64:
        return 32
    if H >= 8:
        return H // 2
    return H


# ---------------- shared BN-fold + clamp + LIF + MaxPool2x2 tail -------------
def _bn_clamp_lif_pool(acc, sb_ref, cl_ref, o_ref, v_ref, TH, W, Cout):
    # acc: (TH*W, Cout) f32 conv output for this row tile.
    scale = sb_ref[0:1, :]
    bias = sb_ref[1:2, :]
    y = acc * scale + bias                           # eval-mode BatchNorm fold
    lo = cl_ref[0, 0, 0:1, :]                        # clamp_m (per n, t, c)
    hi = cl_ref[0, 0, 1:2, :]                        # clamp_w
    y = jnp.minimum(jnp.maximum(y, lo), hi)          # torch.clamp(out, m, w)

    # LIF (tau=2, v_th=1, v_reset=0, decay_input=True, hard reset)
    v = v_ref[...] + (y - v_ref[...]) * (1.0 / TAU)
    fired = v >= V_TH
    spike = jnp.where(fired, jnp.float32(1.0), jnp.float32(0.0))
    v_ref[...] = jnp.where(fired, jnp.float32(V_RESET), v)

    # in-kernel 2x2 max pool
    sp = spike.reshape(TH // 2, 2, W, Cout)
    hmax = jnp.maximum(sp[:, 0], sp[:, 1])           # (TH/2, W, C)
    hm2 = hmax.reshape(TH // 2, W // 2, 2, Cout)
    pooled = jnp.maximum(hm2[:, :, 0], hm2[:, :, 1])  # (TH/2, W/2, C)
    o_ref[0, 0] = pooled.astype(o_ref.dtype)


# ------------- 3x3 conv block (layers 2-4): in-kernel im2col, halo DMA -------
def _make_conv3x3_kernel(TH, W, Cin, Cout):
    def kernel(x_hbm, w_ref, sb_ref, cl_ref, o_ref, xp_ref, v_ref):
        # x_hbm : (N, T, H+2, W+2, Cin) bf16 spikes, zero-padded in wrapper
        # w_ref : (9*Cin, Cout) bf16     im2col-ordered weights (ky, kx, ci)
        # sb_ref: (2, Cout) f32          [scale; bias] folded BatchNorm
        # cl_ref: (1, 1, 2, Cout) f32    [clamp_m; clamp_w] for this (n, t)
        # o_ref : (1, 1, TH/2, W/2, Cout) pooled spikes
        # xp_ref: VMEM (TH+2, W+2, Cin) bf16  halo slab
        # v_ref : VMEM (TH*W, Cout) f32       LIF membrane, persists across T
        n = pl.program_id(0)
        r = pl.program_id(1)
        t = pl.program_id(2)

        @pl.when(t == 0)
        def _():
            v_ref[...] = jnp.zeros_like(v_ref)       # functional.reset_net

        # halo slab: padded rows [r*TH, r*TH + TH + 2)
        pltpu.sync_copy(x_hbm.at[n, t, pl.ds(r * TH, TH + 2)], xp_ref)

        # full im2col: K = 9*Cin, one MXU matmul (bf16 operands, f32 accum)
        slabs = [
            xp_ref[ky:ky + TH, kx:kx + W, :].reshape(TH * W, Cin)
            for ky in range(3) for kx in range(3)
        ]
        patches = jnp.concatenate(slabs, axis=-1)     # (TH*W, 9*Cin)
        acc = jnp.dot(patches, w_ref[...], preferred_element_type=jnp.float32)

        _bn_clamp_lif_pool(acc, sb_ref, cl_ref, o_ref, v_ref, TH, W, Cout)

    return kernel


def conv3x3_block(x_pad, w, sb, cl, out_dtype=jnp.bfloat16):
    # x_pad: (N, T, H+2, W+2, Cin) spike activations, zero-padded by 1 pixel.
    N, T, Hp, Wp, Cin = x_pad.shape
    H, W = Hp - 2, Wp - 2
    Cout = w.shape[-1]
    TH = _pick_row_tile(H)
    assert H % TH == 0 and TH % 2 == 0 and W % 2 == 0
    R = H // TH
    kernel = _make_conv3x3_kernel(TH, W, Cin, Cout)
    return pl.pallas_call(
        kernel,
        out_shape=jax.ShapeDtypeStruct((N, T, H // 2, W // 2, Cout), out_dtype),
        grid_spec=pltpu.PrefetchScalarGridSpec(
            num_scalar_prefetch=0,
            grid=(N, R, T),
            in_specs=[
                pl.BlockSpec(memory_space=pl.ANY),                    # HBM
                pl.BlockSpec((9 * Cin, Cout), lambda n, r, t: (0, 0)),
                pl.BlockSpec((2, Cout), lambda n, r, t: (0, 0)),
                pl.BlockSpec((1, 1, 2, Cout), lambda n, r, t: (n, t, 0, 0)),
            ],
            out_specs=pl.BlockSpec((1, 1, TH // 2, W // 2, Cout),
                                   lambda n, r, t: (n, t, r, 0, 0)),
            scratch_shapes=[
                pltpu.VMEM((TH + 2, Wp, Cin), x_pad.dtype),   # bf16 halo slab
                pltpu.VMEM((TH * W, Cout), jnp.float32),      # LIF membrane
            ],
        ),
        compiler_params=pltpu.CompilerParams(
            dimension_semantics=("parallel", "parallel", "arbitrary"),
            vmem_limit_bytes=CONV_VMEM_LIMIT),
    )(x_pad, w.astype(jnp.bfloat16), sb, cl)


# ------------- layer-1 block: wrapper-side im2col (K = 9*Cin = 18) -----------
def _make_conv1x1_kernel(TH, W, K, Cout):
    def kernel(x_ref, w_ref, sb_ref, cl_ref, o_ref, v_ref):
        # x_ref: (1, 1, TH, W, K) bf16 pre-built 3x3 patches for this row tile
        t = pl.program_id(2)

        @pl.when(t == 0)
        def _():
            v_ref[...] = jnp.zeros_like(v_ref)       # functional.reset_net

        patches = x_ref[0, 0].reshape(TH * W, K).astype(jnp.bfloat16)
        acc = jnp.dot(patches, w_ref[...], preferred_element_type=jnp.float32)
        _bn_clamp_lif_pool(acc, sb_ref, cl_ref, o_ref, v_ref, TH, W, Cout)

    return kernel


def conv_im2col_block(x, w, sb, cl, out_dtype=jnp.bfloat16):
    # x: (N, T, H, W, 9*Cin) pre-im2col'd input (layer 1, Cin=2 -> K=18).
    N, T, H, W, K = x.shape
    Cout = w.shape[-1]
    TH = _pick_row_tile(H)
    assert H % TH == 0 and TH % 2 == 0 and W % 2 == 0
    R = H // TH
    kernel = _make_conv1x1_kernel(TH, W, K, Cout)
    return pl.pallas_call(
        kernel,
        out_shape=jax.ShapeDtypeStruct((N, T, H // 2, W // 2, Cout), out_dtype),
        grid_spec=pltpu.PrefetchScalarGridSpec(
            num_scalar_prefetch=0,
            grid=(N, R, T),
            in_specs=[
                pl.BlockSpec((1, 1, TH, W, K), lambda n, r, t: (n, t, r, 0, 0)),
                pl.BlockSpec((K, Cout), lambda n, r, t: (0, 0)),
                pl.BlockSpec((2, Cout), lambda n, r, t: (0, 0)),
                pl.BlockSpec((1, 1, 2, Cout), lambda n, r, t: (n, t, 0, 0)),
            ],
            out_specs=pl.BlockSpec((1, 1, TH // 2, W // 2, Cout),
                                   lambda n, r, t: (n, t, r, 0, 0)),
            scratch_shapes=[pltpu.VMEM((TH * W, Cout), jnp.float32)],
        ),
        compiler_params=pltpu.CompilerParams(
            dimension_semantics=("parallel", "parallel", "arbitrary"),
            vmem_limit_bytes=CONV_VMEM_LIMIT),
    )(x, w.astype(jnp.bfloat16), sb, cl)


# --------------------------- fused Linear + LIF ------------------------------
def _fc_lif_kernel(x_ref, w_ref, b_ref, o_ref):
    # One matmul over all (T*N) rows, then the LIF recurrence over T with the
    # membrane carried in vregs (no per-timestep M=1 matmuls, weight loaded once).
    T, N, F = x_ref.shape
    O = w_ref.shape[1]
    y = jnp.dot(x_ref[...].reshape(T * N, F).astype(jnp.bfloat16), w_ref[...],
                preferred_element_type=jnp.float32)
    y = y.reshape(T, N, O) + b_ref[...]
    v = jnp.zeros((N, O), jnp.float32)
    for t in range(T):          # static unroll; T is small (16 in production)
        v = v + (y[t] - v) * (1.0 / TAU)
        fired = v >= V_TH
        spike = jnp.where(fired, jnp.float32(1.0), jnp.float32(0.0))
        o_ref[t] = spike.astype(o_ref.dtype)
        v = jnp.where(fired, jnp.float32(V_RESET), v)


def fc_lif(x, w, b, out_dtype=jnp.bfloat16):
    # x: (T, N, F) @ w: (F, O) + b: (1, O) -> spikes (T, N, O)
    T, N, F = x.shape
    O = w.shape[1]
    return pl.pallas_call(
        _fc_lif_kernel,
        out_shape=jax.ShapeDtypeStruct((T, N, O), out_dtype),
        grid_spec=pltpu.PrefetchScalarGridSpec(
            num_scalar_prefetch=0,
            grid=(1,),
            in_specs=[
                pl.BlockSpec((T, N, F), lambda i: (0, 0, 0)),
                pl.BlockSpec((F, O), lambda i: (0, 0)),
                pl.BlockSpec((1, O), lambda i: (0, 0)),
            ],
            out_specs=pl.BlockSpec((T, N, O), lambda i: (0, 0, 0)),
        ),
        compiler_params=pltpu.CompilerParams(
            dimension_semantics=("arbitrary",),
            vmem_limit_bytes=FC_VMEM_LIMIT),
    )(x, w.astype(jnp.bfloat16), b)


# -------------------------- full forward (wrapper) ---------------------------
def _clamp_nt(p, T, N):
    # torch clamp params have shape [T, N, C, 1, 1] -> merged (N, T, 2, C)
    C = p["w"].shape[-1]
    cm = p["clamp_m"].reshape(T, N, C)
    cw = p["clamp_w"].reshape(T, N, C)
    return jnp.transpose(jnp.stack([cm, cw], axis=2), (1, 0, 2, 3))


def clean_cifar10dvs_forward(x, params):
    """CleanCIFAR10DVSNet.forward with clamping_method='clamp' (inference).

    x: [T, N, Cin, H, W] float32.  Returns [T, N, num_classes].
    """
    T, N, Cin, H, W = x.shape

    # ---- block 1: conv_fc[0..3] with wrapper-side im2col (K = 9*Cin = 18) ---
    xt = jnp.transpose(x, (1, 0, 3, 4, 2))                 # (N, T, H, W, Cin)
    xpad = jnp.pad(xt, ((0, 0), (0, 0), (1, 1), (1, 1), (0, 0)))
    patches = jnp.concatenate(
        [xpad[:, :, ky:ky + H, kx:kx + W, :]
         for ky in range(3) for kx in range(3)],
        axis=-1).astype(jnp.bfloat16)                      # (N, T, H, W, 9*Cin)
    p = params["conv"][0]
    h = conv_im2col_block(patches, p["w"], p["sb"], _clamp_nt(p, T, N))
    H, W = H // 2, W // 2

    # ---- blocks 2-4: conv_fc[4..15], fused 3x3 + BN + clamp + LIF + pool ----
    for blk in range(1, 4):
        p = params["conv"][blk]
        h_pad = jnp.pad(h, ((0, 0), (0, 0), (1, 1), (1, 1), (0, 0)))
        h = conv3x3_block(h_pad, p["w"], p["sb"], _clamp_nt(p, T, N))
        H, W = H // 2, W // 2

    C = h.shape[-1]
    # conv_fc[16] Flatten in torch's channel-major (C, H, W) order per step.
    h = jnp.transpose(h, (1, 0, 4, 2, 3)).reshape(T, N, C * H * W)
    # conv_fc[17], conv_fc[20] Dropout: identity at inference time.
    h = fc_lif(h, params["fc1_w"], params["fc1_b"],
               out_dtype=jnp.bfloat16)                     # conv_fc[18]+[19]
    h = fc_lif(h, params["fc2_w"], params["fc2_b"],
               out_dtype=jnp.float32)                      # conv_fc[21]+[22]
    # conv_fc[23] VotingLayer(voter): group-average (trivial JAX glue).
    voter = params["voter"]
    nf = params["fc2_w"].shape[1]
    return h.reshape(T, N, nf // voter, voter).mean(axis=-1)


# ----------------------- deterministic parameter init ------------------------
def init_params(key, T, N, in_ch, channels, H, hidden, out_features, voter,
                init_dis=10.0):
    conv = []
    c_in = in_ch
    for _ in range(4):
        key, kw, kg, kb, km, kv = jax.random.split(key, 6)
        w = jax.random.normal(kw, (3, 3, c_in, channels), jnp.float32)
        w = w * (1.0 / (9.0 * c_in) ** 0.5)
        gamma = jax.random.uniform(kg, (channels,), jnp.float32, 0.8, 1.2)
        beta = jax.random.normal(kb, (channels,), jnp.float32) * 0.05
        mean = jax.random.normal(km, (channels,), jnp.float32) * 0.05
        var = jax.random.uniform(kv, (channels,), jnp.float32, 0.9, 1.1)
        scale = gamma / jnp.sqrt(var + BN_EPS)
        bias = beta - mean * scale
        conv.append(dict(
            w=w.reshape(9 * c_in, channels),          # im2col (ky, kx, ci) order
            sb=jnp.stack([scale, bias], axis=0),      # (2, Cout)
            # clamp_w* = ones + init_dis, clamp_m* = ones - init_dis,
            # shape [T, batch, channels, 1, 1] as in the torch module.
            clamp_w=jnp.full((T, N, channels, 1, 1), 1.0 + init_dis, jnp.float32),
            clamp_m=jnp.full((T, N, channels, 1, 1), 1.0 - init_dis, jnp.float32),
        ))
        c_in = channels
    Hf = H // 16  # four 2x2 maxpools
    feat = channels * Hf * Hf
    key, k1, k2, k3, k4 = jax.random.split(key, 5)
    fc1_w = jax.random.normal(k1, (feat, hidden), jnp.float32) / (feat ** 0.5)
    fc1_b = (jax.random.normal(k2, (hidden,), jnp.float32) * 0.01).reshape(1, hidden)
    fc2_w = jax.random.normal(k3, (hidden, out_features), jnp.float32) / (hidden ** 0.5)
    fc2_b = (jax.random.normal(k4, (out_features,), jnp.float32) * 0.01).reshape(1, out_features)
    return dict(conv=conv, fc1_w=fc1_w, fc1_b=fc1_b,
                fc2_w=fc2_w, fc2_b=fc2_b, voter=voter)


if __name__ == "__main__":
    # Small shapes consistent with the module (orig: T=16, N=1, C=128, 128x128,
    # hidden=512, out=100, voter=10).
    T, N = 4, 2
    in_ch, channels = 2, 16
    H = W = 16
    hidden, out_features, voter = 32, 100, 10

    key = jax.random.PRNGKey(0)
    kx, kp = jax.random.split(key)
    x = jax.random.normal(kx, (T, N, in_ch, H, W), jnp.float32)
    params = init_params(kp, T, N, in_ch, channels, H, hidden,
                         out_features, voter, init_dis=10.0)

    out = clean_cifar10dvs_forward(x, params)
    out = jax.block_until_ready(out)
    assert out.shape == (T, N, out_features // voter), out.shape
    print("KERNEL_OK")
</pallas_src>

<mosaic_0001>
module attributes {stable_mosaic.version = 11 : i64} {
  func.func @kernel(%arg0: i32, %arg1: i32, %arg2: i32, %arg3: memref<1x1x8x16x18xbf16, #tpu.memory_space<vmem>>, %arg4: memref<18x16xbf16, #tpu.memory_space<vmem>>, %arg5: memref<2x16xf32, #tpu.memory_space<vmem>>, %arg6: memref<1x1x2x16xf32, #tpu.memory_space<vmem>>, %arg7: memref<1x1x4x8x16xbf16, #tpu.memory_space<vmem>>, %arg8: memref<128x16xf32, #tpu.memory_space<vmem>>) attributes {dimension_semantics = [#tpu.dimension_semantics<parallel>, #tpu.dimension_semantics<parallel>, #tpu.dimension_semantics<arbitrary>], iteration_bounds = array<i64: 2, 2, 4>, scalar_prefetch = 0 : i64, scratch_operands = 1 : i64, tpu.core_type = #tpu.core_type<tc>, window_params = [{transform_indices = @transform_0, window_bounds = array<i64: 1, 1, 8, 16, 18>}, {pipeline_mode = #tpu.pipeline_mode<synchronous>, transform_indices = @transform_1, window_bounds = array<i64: 18, 16>}, {pipeline_mode = #tpu.pipeline_mode<synchronous>, transform_indices = @transform_2, window_bounds = array<i64: 2, 16>}, {transform_indices = @transform_3, window_bounds = array<i64: 1, 1, 2, 16>}, {transform_indices = @transform_4, window_bounds = array<i64: 1, 1, 4, 8, 16>}]} {
    %c0_i32 = arith.constant 0 : i32
    %0 = arith.cmpi eq, %arg2, %c0_i32 : i32
    %1 = arith.extui %0 : i1 to i32
    %c0_i32_0 = arith.constant 0 : i32
    %2 = arith.cmpi ne, %1, %c0_i32_0 : i32
    scf.if %2 {
      %cst_34 = arith.constant 0.000000e+00 : f32
      %52 = vector.broadcast %cst_34 : f32 to vector<128x16xf32>
      %c0_35 = arith.constant 0 : index
      %c0_36 = arith.constant 0 : index
      %53 = vector.load %arg8[%c0_35, %c0_36] : memref<128x16xf32, #tpu.memory_space<vmem>>, vector<128x16xf32>
      tpu.vector_store %arg8[%c0_35, %c0_36], %52 {strides = array<i32>} : memref<128x16xf32, #tpu.memory_space<vmem>>, vector<128x16xf32>,
    } else {
    }
    %c0 = arith.constant 0 : index
    %c0_1 = arith.constant 0 : index
    %c0_2 = arith.constant 0 : index
    %c0_3 = arith.constant 0 : index
    %c0_4 = arith.constant 0 : index
    %3 = vector.load %arg3[%c0, %c0_1, %c0_2, %c0_3, %c0_4] : memref<1x1x8x16x18xbf16, #tpu.memory_space<vmem>>, vector<1x1x8x16x18xbf16>
    %4 = vector.shape_cast %3 : vector<1x1x8x16x18xbf16> to vector<8x16x18xbf16>
    %5 = vector.shape_cast %4 : vector<8x16x18xbf16> to vector<128x18xbf16>
    %c0_5 = arith.constant 0 : index
    %c0_6 = arith.constant 0 : index
    %6 = vector.load %arg4[%c0_5, %c0_6] : memref<18x16xbf16, #tpu.memory_space<vmem>>, vector<18x16xbf16>
    %cst = arith.constant dense<0.000000e+00> : vector<128x16xf32>
    %7 = tpu.matmul %5, %6, %cst {dimension_numbers = #tpu.dot_dimension_numbers<[1], [0], [0], [1], [0, 0, 1, 1], [], []>} : vector<128x18xbf16>, vector<18x16xbf16>, vector<128x16xf32> -> vector<128x16xf32>
    %c0_7 = arith.constant 0 : index
    %c0_8 = arith.constant 0 : index
    %8 = vector.load %arg5[%c0_7, %c0_8] : memref<2x16xf32, #tpu.memory_space<vmem>>, vector<1x16xf32>
    %c1 = arith.constant 1 : index
    %c0_9 = arith.constant 0 : index
    %9 = vector.load %arg5[%c1, %c0_9] : memref<2x16xf32, #tpu.memory_space<vmem>>, vector<1x16xf32>
    %10 = vector.broadcast %8 : vector<1x16xf32> to vector<128x16xf32>
    %11 = arith.mulf %7, %10 : vector<128x16xf32>
    %12 = vector.broadcast %9 : vector<1x16xf32> to vector<128x16xf32>
    %13 = arith.addf %11, %12 : vector<128x16xf32>
    %c0_10 = arith.constant 0 : index
    %c0_11 = arith.constant 0 : index
    %c0_12 = arith.constant 0 : index
    %c0_13 = arith.constant 0 : index
    %14 = vector.load %arg6[%c0_10, %c0_11, %c0_12, %c0_13] : memref<1x1x2x16xf32, #tpu.memory_space<vmem>>, vector<1x1x1x16xf32>
    %15 = vector.shape_cast %14 : vector<1x1x1x16xf32> to vector<1x16xf32>
    %c0_14 = arith.constant 0 : index
    %c0_15 = arith.constant 0 : index
    %c1_16 = arith.constant 1 : index
    %c0_17 = arith.constant 0 : index
    %16 = vector.load %arg6[%c0_14, %c0_15, %c1_16, %c0_17] : memref<1x1x2x16xf32, #tpu.memory_space<vmem>>, vector<1x1x1x16xf32>
    %17 = vector.shape_cast %16 : vector<1x1x1x16xf32> to vector<1x16xf32>
    %18 = vector.broadcast %15 : vector<1x16xf32> to vector<128x16xf32>
    %19 = arith.maximumf %13, %18 : vector<128x16xf32>
    %20 = vector.broadcast %17 : vector<1x16xf32> to vector<128x16xf32>
    %21 = arith.minimumf %19, %20 : vector<128x16xf32>
    %c0_18 = arith.constant 0 : index
    %c0_19 = arith.constant 0 : index
    %22 = vector.load %arg8[%c0_18, %c0_19] : memref<128x16xf32, #tpu.memory_space<vmem>>, vector<128x16xf32>
    %c0_20 = arith.constant 0 : index
    %c0_21 = arith.constant 0 : index
    %23 = vector.load %arg8[%c0_20, %c0_21] : memref<128x16xf32, #tpu.memory_space<vmem>>, vector<128x16xf32>
    %24 = arith.subf %21, %23 : vector<128x16xf32>
    %cst_22 = arith.constant 5.000000e-01 : f32
    %25 = vector.broadcast %cst_22 : f32 to vector<128x16xf32>
    %26 = arith.mulf %24, %25 : vector<128x16xf32>
    %27 = arith.addf %22, %26 : vector<128x16xf32>
    %cst_23 = arith.constant 1.000000e+00 : f32
    %28 = vector.broadcast %cst_23 : f32 to vector<128x16xf32>
    %29 = arith.cmpf oge, %27, %28 : vector<128x16xf32>
    %cst_24 = arith.constant 1.000000e+00 : f32
    %cst_25 = arith.constant 0.000000e+00 : f32
    %30 = vector.broadcast %cst_24 : f32 to vector<128x16xf32>
    %31 = vector.broadcast %cst_25 : f32 to vector<128x16xf32>
    %32 = arith.select %29, %30, %31 : vector<128x16xi1>, vector<128x16xf32>
    %cst_26 = arith.constant 0.000000e+00 : f32
    %33 = vector.broadcast %cst_26 : f32 to vector<128x16xf32>
    %34 = arith.select %29, %33, %27 : vector<128x16xi1>, vector<128x16xf32>
    %c0_27 = arith.constant 0 : index
    %c0_28 = arith.constant 0 : index
    %35 = vector.load %arg8[%c0_27, %c0_28] : memref<128x16xf32, #tpu.memory_space<vmem>>, vector<128x16xf32>
    tpu.vector_store %arg8[%c0_27, %c0_28], %34 {strides = array<i32>} : memref<128x16xf32, #tpu.memory_space<vmem>>, vector<128x16xf32>,
    %36 = vector.shape_cast %32 : vector<128x16xf32> to vector<4x2x16x16xf32>
    %37 = vector.extract_strided_slice %36 {offsets = [0, 0, 0, 0], sizes = [4, 1, 16, 16], strides = [1, 1, 1, 1]} : vector<4x2x16x16xf32> to vector<4x1x16x16xf32>
    %38 = vector.shape_cast %37 : vector<4x1x16x16xf32> to vector<4x16x16xf32>
    %39 = vector.extract_strided_slice %36 {offsets = [0, 1, 0, 0], sizes = [4, 1, 16, 16], strides = [1, 1, 1, 1]} : vector<4x2x16x16xf32> to vector<4x1x16x16xf32>
    %40 = vector.shape_cast %39 : vector<4x1x16x16xf32> to vector<4x16x16xf32>
    %41 = arith.maximumf %38, %40 : vector<4x16x16xf32>
    %42 = vector.shape_cast %41 : vector<4x16x16xf32> to vector<4x8x2x16xf32>
    %43 = vector.extract_strided_slice %42 {offsets = [0, 0, 0, 0], sizes = [4, 8, 1, 16], strides = [1, 1, 1, 1]} : vector<4x8x2x16xf32> to vector<4x8x1x16xf32>
    %44 = vector.shape_cast %43 : vector<4x8x1x16xf32> to vector<4x8x16xf32>
    %45 = vector.extract_strided_slice %42 {offsets = [0, 0, 1, 0], sizes = [4, 8, 1, 16], strides = [1, 1, 1, 1]} : vector<4x8x2x16xf32> to vector<4x8x1x16xf32>
    %46 = vector.shape_cast %45 : vector<4x8x1x16xf32> to vector<4x8x16xf32>
    %47 = arith.maximumf %44, %46 : vector<4x8x16xf32>
    %48 = arith.truncf %47 : vector<4x8x16xf32> to vector<4x8x16xbf16>
    %c0_29 = arith.constant 0 : index
    %c0_30 = arith.constant 0 : index
    %c0_31 = arith.constant 0 : index
    %c0_32 = arith.constant 0 : index
    %c0_33 = arith.constant 0 : index
    %49 = vector.load %arg7[%c0_29, %c0_30, %c0_31, %c0_32, %c0_33] : memref<1x1x4x8x16xbf16, #tpu.memory_space<vmem>>, vector<1x1x4x8x16xbf16>
    %50 = vector.shape_cast %49 : vector<1x1x4x8x16xbf16> to vector<4x8x16xbf16>
    %51 = vector.shape_cast %48 : vector<4x8x16xbf16> to vector<1x1x4x8x16xbf16>
    tpu.vector_store %arg7[%c0_29, %c0_30, %c0_31, %c0_32, %c0_33], %51 {strides = array<i32>} : memref<1x1x4x8x16xbf16, #tpu.memory_space<vmem>>, vector<1x1x4x8x16xbf16>,
    return
  }
  func.func @transform_0(%arg0: i32, %arg1: i32, %arg2: i32) -> (i32, i32, i32, i32, i32) {
    %c0_i32 = arith.constant 0 : i32
    %c0_i32_0 = arith.constant 0 : i32
    %c0_i32_1 = arith.constant 0 : i32
    return %arg0, %arg2, %arg1, %c0_i32, %c0_i32_0 : i32, i32, i32, i32, i32
  }
  func.func @transform_1(%arg0: i32, %arg1: i32, %arg2: i32) -> (i32, i32) {
    %c0_i32 = arith.constant 0 : i32
    %c0_i32_0 = arith.constant 0 : i32
    %c0_i32_1 = arith.constant 0 : i32
    return %c0_i32, %c0_i32_0 : i32, i32
  }
  func.func @transform_2(%arg0: i32, %arg1: i32, %arg2: i32) -> (i32, i32) {
    %c0_i32 = arith.constant 0 : i32
    %c0_i32_0 = arith.constant 0 : i32
    %c0_i32_1 = arith.constant 0 : i32
    return %c0_i32, %c0_i32_0 : i32, i32
  }
  func.func @transform_3(%arg0: i32, %arg1: i32, %arg2: i32) -> (i32, i32, i32, i32) {
    %c0_i32 = arith.constant 0 : i32
    %c0_i32_0 = arith.constant 0 : i32
    %c0_i32_1 = arith.constant 0 : i32
    return %arg0, %arg2, %c0_i32, %c0_i32_0 : i32, i32, i32, i32
  }
  func.func @transform_4(%arg0: i32, %arg1: i32, %arg2: i32) -> (i32, i32, i32, i32, i32) {
    %c0_i32 = arith.constant 0 : i32
    %c0_i32_0 = arith.constant 0 : i32
    %c0_i32_1 = arith.constant 0 : i32
    return %arg0, %arg2, %arg1, %c0_i32, %c0_i32_0 : i32, i32, i32, i32, i32
  }
}

</mosaic_0001>

<bundles_post_ra>
// kernel: tpu_custom_call.1
= control target key start
LH: loop header
LB: loop body
LE: loop exit
PB: predicated region body
PF: predicated region fallthrough
CT: control target
= control target key end

     0   :  { %s2383_s0 = inlined_call_operand.hbm [shape: bf16[2,4,16,16,18], index: 0, kind: input, shape index: {}]   ;;  %s2384_s1 = inlined_call_operand.vmem [shape: bf16[18,16], index: 1, kind: input, shape index: {}]   ;;  %s2385_s2 = inlined_call_operand.vmem [shape: f32[2,16], index: 2, kind: input, shape index: {}]   ;;  %s2386_s3 = inlined_call_operand.vmem [shape: f32[2,4,2,16], index: 3, kind: input, shape index: {}]   ;;  %s2387_s4 = inlined_call_operand.hbm [shape: bf16[2,4,8,8,16], index: 4, kind: output, shape index: {}]  }
   0x1   :  { %2397 = sst [smem:[#allocation15_spill]] %s2385_s2 }
   0x2   :  { %2398 = sst [smem:[#allocation16_spill]] %s2387_s4 }
   0x3   :  { %9 = vsyncpa [#allocation4], 0 }
   0x4   :  { %11 = vsyncpa [#allocation4 + $0x1], 0 }
   0x5   :  { %12 = vsyncpa [#allocation5], 0 }
   0x6   :  { %14 = vsyncpa [#allocation5 + $0x1], 0  ;;  %s1863_s15 = smov 0   ;;  %s1865_s16 = smov 0  }
   0x7   :  { %s1867_s17 = smov 0   ;;  %s1869_s18 = smov 0  }
   0x8   :  { %s1871_s19 = smov 0   ;;  %s1873_s20 = smov 0  }
   0x9   :  { %s1875_s21 = smov 0   ;;  %s1877_s22 = smov 0  }
   0xa   :  { %s1879_s23 = smov 0   ;;  %s1881_s24 = smov 0  }
   0xb LB: > { %2399 = sst [smem:[#allocation9_spill]] %s1791_s15  ;;  %s1394_s25 = sadd.s32 4294967295, %s1827_s24   ;;  %s1827_s24 = sphi %s1881_s24, %s20_s24   ;;  %s1823_s23 = sphi %s1879_s23, %s2429_s23   ;;  %s1819_s22 = sphi %s1877_s22, %s2428_s22   ;;  %s1815_s21 = sphi %s1875_s21, %s2427_s21   ;;  %s1811_s20 = sphi %s1873_s20, %s2426_s20   ;;  %s1807_s19 = sphi %s1871_s19, %s2425_s19   ;;  %s1803_s18 = sphi %s1869_s18, %s2424_s18   ;;  %s1799_s17 = sphi %s1867_s17, %s2423_s17   ;;  %s1795_s16 = sphi %s1865_s16, %s2422_s16   ;;  %s1791_s15 = sphi %s1863_s15, %s2421_s15  }
   0xc   : > { %2400 = sst [smem:[#allocation10_spill]] %s1807_s19  ;;  %s1395_s26 = sadd.s32 4294967294, %s1827_s24  }
   0xd   : > { %s32_s27 = sadd.s32 1, %s1815_s21  ;;  %s35_s28 = sadd.s32 1, %s1819_s22 }
   0xe   : > { %p33_p0 = scmp.ge.s32.totalorder %s32_s27, 4  ;;  %s39_s29 = sadd.s32 1, %s1823_s23 }
   0xf   : > { %s50_s30 = sadd.s32 1, %s1799_s17  ;;  %p57_p1 = scmp.ne.s32.totalorder %s1799_s17, %s1795_s16 }
  0x10   : > { %s2431_s27 = smov (%p33_p0, %s32_s27), 0  ;;  %s2433_s28 = smov (!%p33_p0, %s35_s28), %s1819_s22 }
  0x11   : > { %2401 = sst [smem:[#allocation11_spill]] %s2431_s27  ;;  %s44_s5 = ssub.s32 %s1815_s21, %s2431_s27 }
  0x12   : > { %p58_p2 = scmp.eq.s32.totalorder %s1827_s24, 0  ;;  %p37_p3 = scmp.ge.s32.totalorder %s2433_s28, 2 }
  0x13   : > { %p63_p4 = scmp.ne.s32.totalorder %s1795_s16, %s1791_s15  ;;  %p64_p6 = scmp.eq.s32.totalorder %s1394_s25, 0 }
  0x14   : > { %p1932_p5 = por %p58_p2, %p57_p1  ;;  %s2435_s28 = smov (%p37_p3, %s2433_s28), 0 }
  0x15   : > { %2403 = sst [smem:[#allocation12_spill]] %s2435_s28  ;;  %s2437_s29 = smov (!%p37_p3, %s39_s29), %s1823_s23 }
  0x16   : > { %s46_s7 = ssub.s32 %s1819_s22, %s2435_s28  ;;  %p1941_p7 = por %p64_p6, %p63_p4 }
  0x17   : > { %p41_p8 = scmp.ge.s32.totalorder %s2437_s29, 2  ;;  %p161_p9 = scmp.eq.s32.totalorder %s1394_s25, 15 }
  0x18   : > { %p167_p10 = scmp.eq.s32.totalorder %s1395_s26, 15  ;;  %p1584_p13 = scmp.lt.s32.totalorder %s1827_s24, 16 }
  0x19   : > { %s2439_s29 = smov (%p41_p8, %s2437_s29), 0  ;;  %p1950_p11 = por %p161_p9, %p57_p1 }
  0x1a   : > { %2405 = sst [smem:[#allocation13_spill]] %s2439_s29  ;;  %p1954_p12 = por %p167_p10, %p63_p4 }
  0x1b   : > { %s2406_s9 = scalar_select %p1950_p11, 1, 0 }
  0x1c   : > { %s2408_s10 = scalar_select %p1954_p12, 1, 0 }
  0x1d   : > { %2407 = sst [smem:[#allocation14_spill]] %s2406_s9  ;;  %s43_s11 = ssub.s32 %s1823_s23, %s2439_s29 }
  0x1e   : > { %s45_s12 = sor.u32 %s44_s5, %s43_s11  ;;  %s193_s13 = sand.u32 1, %s1799_s17  }
  0x1f   : > { %s47_s14 = sor.u32 %s46_s7, %s45_s12  ;;  %s1398_s25 = sshll.u32 %s193_s13, 6 }
  0x20   : > { %p48_p0 = scmp.eq.s32.totalorder %s47_s14, 0  ;;  %s1503_s26 = sshll.u32 %s1819_s22, 4 }
  0x21   : > { %s1401_s27 = sshll.u32 %s1815_s21, 5  ;;  %s1402_s15 = sshll.u32 %s1823_s23, 7 }
  0x22   : > { %s1964_s28 = scalar_select %p48_p0, %s1799_s17, %s50_s30  }
  0x23   : > { %s204_s4 = sadd.s32 %s1503_s26, %s1401_s27  ;;  %s197_s9 = scalar_lea.vmem [#allocation3], %s1398_s25 }
  0x24   : > { %s209_s19 = sshll.u32 %s197_s9, 4  ;;  %s206_s2 = sadd.s32 %s1402_s15, %s204_s4  ;;  %s1968_s19 = int_to_ptr.vmem [resolvable:$true] %s209_s19 }
  0x25   : > { %s1403_s29 = sshll.u32 %s206_s2, 6  ;;  %p1974_p1 = pnand %p1584_p13, %p1932_p5 }
  0x26   : > { %s1981_s30 = scalar_lea.hbm %s2383_s0, %s1403_s29  ;;  %s1983_s4 = scalar_lea.sflag [#allocation4], %s193_s13 }
  0x27   : > { %s1683_s2 = scalar_lea.hbm %s1981_s30, 1024  ;;  %p1685_p3 = pneg %p1974_p1 }
  0x28   : > { %p1684_p2 = scmp.ne.s32.totalorder %s1981_s30, %s1683_s2  ;;  %s1688_s6 = scalar_lea.hbm %s2383_s0, 16384 }
  0x29   : > { %p1689_p6 = scmp.lt.u32.totalorder %s1981_s30, %s2383_s0  ;;  %p1690_p8 = scmp.lt.u32.totalorder %s1688_s6, %s1683_s2 }
  0x2a   : > { %p1686_p4 = pnand %p1685_p3, %p1684_p2  ;;  %p1692_p10 = scmp.lt.u32.totalorder %s1683_s2, %s1981_s30 }
  0x2b   : > { %p1691_p9 = por %p1690_p8, %p1689_p6 }
  0x2c   : > { %p1687_p5 = pneg %p1686_p4 }
  0x2d   : > { %p1693_p13 = por %p1692_p10, %p1691_p9 }
  0x2f   : > { %p1694_p0 = pnand %p1693_p13, %p1687_p5 }
  0x31   : > { %1697 = shalt.err (!%p1694_p0)
}
  0x32   : > { %s1698_s12 = scalar_lea.vmem %s1968_s19, 1024  ;;  %s1829_s13 = smov [#allocation3]  }
  0x33   : > { %p1699_p2 = scmp.ne.s32.totalorder %s1968_s19, %s1698_s12  ;;  %s1703_s14 = sshll.u32 %s1829_s13, 4  ;;  %s1704_s14 = int_to_ptr.vmem [resolvable:$false] %s1703_s14 }
  0x34   : > { %s1705_s25 = scalar_lea.vmem %s1704_s14, 2048  ;;  %p1706_p11 = scmp.lt.s32.totalorder %s1968_s19, %s1704_s14 }
  0x35   : > { %p1701_p4 = pnand %p1699_p2, %p1685_p3  ;;  %p1707_p6 = scmp.lt.s32.totalorder %s1705_s25, %s1698_s12 }
  0x37   : > { %p1702_p12 = pneg %p1701_p4  ;;  %p1708_p8 = por %p1707_p6, %p1706_p11 }
  0x39   : > { %p1709_p9 = pnand %p1708_p8, %p1702_p12 }
  0x3b   : > { %1712 = shalt.err (!%p1709_p9)
}
  0x3c   : > { %s1830_s26 = smov 64   ;;  %s1831_s7 = smov 4  }
  0x3d   : > { %1579 = dma.hbm_to_vmem [thread:$0]  (!%p1974_p1), %s1981_s30, 1024, %s1968_s19, %s1983_s4, %s1830_s26, %s1830_s26, %s1831_s7  }
  0x3e   : > { %p1404_p3 = scmp.ge.s32.totalorder %s1827_s24, 1  ;;  %p228_p5 = scmp.lt.s32.totalorder %s1827_s24, 17 }
  0x40   : > { %p229_p10 = pnand %p1404_p3, %p228_p5 }
  0x41   : > { %s2014_s11 = sand.u32 (!%p229_p10), 1, %s1795_s16  }
  0x42   : > { %232 = sbr.rel (%p229_p10) target bundleno = 430 (0x1ae), region = 36  ;;  %s1405_s2 = sshll.u32 (!%p229_p10), %s2014_s11, 6 }
  0x43   : > { %s235_s15 = scalar_lea.sflag (!%p229_p10), [#allocation4], %s2014_s11  ;;  %s2018_s27 = scalar_lea.vmem (!%p229_p10), [#allocation3], %s1405_s2 }
  0x49   : > { %1782 = dma.done.wait (%p1941_p7), %s235_s15, 1024  }
  0x4a   : > { %1784 = vsyncadd (%p1941_p7), %s235_s15, 4294966272  ;;  %s1406_s19 = sshll.u32 %s2014_s11, 4  ;;  %p272_p11 = scmp.lt.s32.totalorder %s1811_s20, 1 }
  0x4b   : > { %p274_p12 = scmp.lt.s32.totalorder %s1803_s18, 3  ;;  %s2034_s8 = scalar_lea.vmem [#allocation6], %s1406_s19 }
  0x4c   : > { %s273_s5 = scalar_select %p272_p11, %s1811_s20, 1 }
  0x4d   : > { %s275_s30 = scalar_select %p274_p12, %s1803_s18, 3 }
  0x4e   : > { %s1407_s4 = sshll.u32 %s273_s5, 2  ;;  %p1409_p7 = scmp.ne.s32.totalorder %s1803_s18, 0 }
  0x4f   : > { %s277_s6 = sadd.s32 %s1407_s4, %s275_s30  ;;  %vm286_vm0 = vcmask (!%p1409_p7), 130048   ;;  %v1832_v0 = vmov (!%p1409_p7), 0.0  }
  0x50   : > { %s1408_s29 = sshll.u32 %s277_s6, 1  ;;  %285 = sbr.rel (%p1409_p7) target bundleno = 88 (0x58), region = 44  ;;  %287 = vst.msk [vmem:[#allocation2] sm:$0xff] (!%p1409_p7), %vm286_vm0, %v1832_v0  ;;  %288 = vst.msk [vmem:[#allocation2 + $0x8] sm:$0xff] (!%p1409_p7), %vm286_vm0, %v1832_v0 }
  0x51   : > { %s2032_s13 = scalar_lea.vmem %s2386_s3, %s1408_s29  ;;  %289 = vst.msk [vmem:[#allocation2 + $0x10] sm:$0xff] (!%p1409_p7), %vm286_vm0, %v1832_v0  ;;  %290 = vst.msk [vmem:[#allocation2 + $0x18] sm:$0xff] (!%p1409_p7), %vm286_vm0, %v1832_v0 }
  0x52   : > { %291 = vst.msk [vmem:[#allocation2 + $0x20] sm:$0xff] (!%p1409_p7), %vm286_vm0, %v1832_v0  ;;  %292 = vst.msk [vmem:[#allocation2 + $0x28] sm:$0xff] (!%p1409_p7), %vm286_vm0, %v1832_v0 }
  0x53   : > { %293 = vst.msk [vmem:[#allocation2 + $0x30] sm:$0xff] (!%p1409_p7), %vm286_vm0, %v1832_v0  ;;  %294 = vst.msk [vmem:[#allocation2 + $0x38] sm:$0xff] (!%p1409_p7), %vm286_vm0, %v1832_v0 }
  0x54   : > { %295 = vst.msk [vmem:[#allocation2 + $0x40] sm:$0xff] (!%p1409_p7), %vm286_vm0, %v1832_v0  ;;  %296 = vst.msk [vmem:[#allocation2 + $0x48] sm:$0xff] (!%p1409_p7), %vm286_vm0, %v1832_v0 }
  0x55   : > { %297 = vst.msk [vmem:[#allocation2 + $0x50] sm:$0xff] (!%p1409_p7), %vm286_vm0, %v1832_v0  ;;  %298 = vst.msk [vmem:[#allocation2 + $0x58] sm:$0xff] (!%p1409_p7), %vm286_vm0, %v1832_v0 }
  0x56   : > { %299 = vst.msk [vmem:[#allocation2 + $0x60] sm:$0xff] (!%p1409_p7), %vm286_vm0, %v1832_v0  ;;  %300 = vst.msk [vmem:[#allocation2 + $0x68] sm:$0xff] (!%p1409_p7), %vm286_vm0, %v1832_v0 }
  0x57   : > { %301 = vst.msk [vmem:[#allocation2 + $0x70] sm:$0xff] %vm286_vm0, %v1832_v0  ;;  %302 = vst.msk [vmem:[#allocation2 + $0x78] sm:$0xff] %vm286_vm0, %v1832_v0 }
  0x58 PF: > { %v1673_v1 = vld [vmem:[%s2384_s1] sm:$0xff]   ;;  %vm396_vm1 = vcmask 1040384   ;;  %v1674_v2 = vld [vmem:[%s2384_s1 + $0x8] ss:$0 sps:$4 sm:$0x11]   ;;  %vm371_vm2 = vcmask 146432   ;;  %v730_v14 = vlaneseq }
  0x59   : > { %v1675_v3 = vld [vmem:[%s2018_s27] sm:$0xff]   ;;  %1546 = vmatprep.subr.bf16.mxu0 %v1673_v1  ;;  %1566 = vmatprep.subr.bf16.mxu1 %v1673_v1  ;;  %v398_v5 = vsel %vm396_vm1, %v1674_v2, 0  ;;  %v1677_v6 = vld [vmem:[%s2018_s27 + $0x8] sm:$0xff]   ;;  %v1679_v8 = vld [vmem:[%s2018_s27 + $0x10] sm:$0xff]   ;;  %v1833_v12 = vmov 1983009808  }
  0x5a   : > { %v1676_v4 = vld [vmem:[%s2018_s27 + $0x20] sm:$0xff]   ;;  %1547 = vmatpush3.bf16.msra.mxu0 %v1673_v1  ;;  %1568 = vmatpush3.bf16.msra.mxu1 %v1673_v1  ;;  %v1678_v7 = vld [vmem:[%s2018_s27 + $0x28] sm:$0xff]   ;;  %v1680_v9 = vld [vmem:[%s2018_s27 + $0x30] sm:$0xff]   ;;  %v728_v13 = vunpack.c.l.s4 %v1833_v12  ;;  %s2410_s19 = sld [smem:[#allocation15_spill]]  ;;  %v731_v17 = vshrl.u32 %v730_v14, 7  ;;  %vm693_vm3 = vcmask 130048  }
  0x5b   : > { %1570 = vmatprep.subr.msk.bf16.mxu0 %vm396_vm1, %v1674_v2  ;;  %1571 = vmatprep.subr.msk.bf16.mxu1 %vm396_vm1, %v1674_v2  ;;  %v1681_v10 = vld [vmem:[%s2018_s27 + $0x18] sm:$0xff]   ;;  %v2088_v25 = vld [vmem:[%s2032_s13] ss:$0 sm:$0xff]  ;;  %v2099_v37 = vld [vmem:[%s2032_s13 + $0x1] ss:$0 sm:$0xff]  ;;  %vm1183_vm11 = vcmask 1041409  }
  0x5c   : > { %1550 = vmatprep.mubr.msk.bf16.mxu0 %vm371_vm2, %v1675_v3  ;;  %1558 = vmatprep.mubr.msk.bf16.mxu1 %vm371_vm2, %v1676_v4  ;;  %v1682_v11 = vld [vmem:[%s2018_s27 + $0x38] sm:$0xff]   ;;  %v729_v16 = vunpack.c.0.s8 %v728_v13  ;;  %v583_v46 = vld [vmem:[#allocation2 + $0x10] sm:$0xff]  ;;  %v581_v54 = vld [vmem:[#allocation2] sm:$0xff]  ;;  %vm1186_vm13 = vcmask 1042434   ;;  %vm1189_vm14 = vcmask 1043459   ;;  %vm1192_vm15 = vcmask 1044484  }
  0x5d   : > { %v591_v47 = vld [vmem:[#allocation2 + $0x50] sm:$0xff]  ;;  %v589_v55 = vld [vmem:[#allocation2 + $0x40] sm:$0xff]  ;;  %v584_v60 = vld [vmem:[#allocation2 + $0x18] sm:$0xff]  ;;  %vm1195_vm0 = vcmask 1045509   ;;  %vm1198_vm1 = vcmask 1046534   ;;  %s2412_s27 = sld [smem:[#allocation10_spill]] }
  0x5e   : > { %1549 = vmatpush3.bf16.msra.mxu0 %v398_v5  ;;  %1569 = vmatpush3.bf16.msra.mxu1 %v398_v5  ;;  %v2091_v27 = vsub.s32 %v729_v16, %v731_v17  ;;  %v592_v61 = vld [vmem:[#allocation2 + $0x58] sm:$0xff]  ;;  %s1498_s29 = sshll.u32 %s1803_s18, 3  ;;  %s1499_s12 = sshll.u32 %s1811_s20, 5 }
  0x5f   : > { %s2413_s20 = sld [smem:[#allocation14_spill]]  ;;  %s1276_s14 = sshll.u32 %s2034_s8, 4  ;;  %s2321_s14 = int_to_ptr.vmem [resolvable:$true] %s1276_s14 }
  0x60   : > { %s2411_s5 = smov %s2410_s19  ;;  %v2078_v15 = vld [vmem:[%s2410_s19] ss:$0 sm:$0xff]  ;;  %s2414_s7 = sld [smem:[#allocation16_spill]] }
  0x61   : > { %1551 = vmatmul.mubr.msk.bf16.vlgmr.msra.gmra.mrb[0].mxu0 %vm371_vm2, %v1677_v6  ;;  %1559 = vmatmul.mubr.msk.bf16.vlgmr.msra.gmra.mrb[0].mxu1 %vm371_vm2, %v1678_v7  ;;  %v2083_v19 = vld [vmem:[%s2411_s5 + $0x1] ss:$0 sm:$0xff]  ;;  %v582_v6 = vld [vmem:[#allocation2 + $0x8] sm:$0xff]  ;;  %s1259_s15 = scalar_lea.sflag [#allocation5], %s2014_s11  ;;  %s1713_s19 = scalar_lea.vmem %s2321_s14, 256 }
  0x62   : > { %1554 = vmatprep.mubr.msk.bf16.mxu0 %vm371_vm2, %v1679_v8  ;;  %1562 = vmatprep.mubr.msk.bf16.mxu1 %vm371_vm2, %v1680_v9  ;;  %v590_v7 = vld [vmem:[#allocation2 + $0x48] sm:$0xff]  ;;  %p1714_p1 = scmp.ne.s32.totalorder %s2321_s14, %s1713_s19  ;;  %s1835_s30 = smov [#allocation6]  }
  0x63   : > { %s1497_s6 = sshll.u32 %s2412_s27, 2  ;;  %s1717_s4 = sshll.u32 %s1835_s30, 4  ;;  %s1718_s4 = int_to_ptr.vmem [resolvable:$false] %s1717_s4 }
  0x64   : > { %s1271_s9 = sadd.s32 %s1498_s29, %s1497_s6  ;;  %s1719_s27 = scalar_lea.vmem %s1718_s4, 512 }
  0x65   : > { %s1273_s18 = sadd.s32 %s1499_s12, %s1271_s9  ;;  %p2415_p13 = scmp.ne.s32.totalorder %s2413_s20, 0 }
  0x66   : > { %s1500_s13 = sshll.u32 %s1273_s18, 6  ;;  %p1720_p4 = scmp.lt.s32.totalorder %s2321_s14, %s1718_s4 }
  0x67   : > { %s2319_s2 = scalar_lea.hbm %s2414_s7, %s1500_s13  ;;  %p1715_p0 = pnand %p1714_p1, %p2415_p13 }
  0x68   : > { %p1721_p6 = scmp.lt.s32.totalorder %s1719_s27, %s1713_s19 }
  0x69   : > { %1555 = vmatmul.mubr.msk.bf16.gmra.mrb[4].mxu0 %vm371_vm2, %v1681_v10  ;;  %1563 = vmatmul.mubr.msk.bf16.gmra.mrb[4].mxu1 %vm371_vm2, %v1682_v11  ;;  %vm1201_vm2 = vcmask 1047559   ;;  %p1716_p2 = pneg %p1715_p0 }
  0x6a   : > { %p1722_p8 = por %p1721_p6, %p1720_p4 }
  0x6c   : > { %p1723_p9 = pnand %p1722_p8, %p1716_p2 }
 0x134   : > { %v1552_v18 = vpop.f32.mrb[0].mxu0  ;;  %v1560_v20 = vpop.f32.mrb[0].mxu1 }
 0x135   : > { %v505_v21 = vmul.f32 %v1552_v18, %v2078_v15  ;;  %v513_v22 = vmul.f32 %v1560_v20, %v2078_v15  ;;  %v434_v23 = vpop.f32.mrb[1].mxu0  ;;  %v466_v24 = vpop.f32.mrb[1].mxu1 }
 0x136   : > { %v503_v26 = vmul.f32 %v2078_v15, %v434_v23  ;;  %v511_v28 = vmul.f32 %v2078_v15, %v466_v24  ;;  %v1553_v29 = vpop.f32.mrb[2].mxu0  ;;  %v1561_v30 = vpop.f32.mrb[2].mxu1 }
 0x137   : > { %v525_v31 = vadd.f32 %v2083_v19, %v505_v21  ;;  %v533_v32 = vadd.f32 %v2083_v19, %v513_v22  ;;  %v506_v33 = vmul.f32 %v1553_v29, %v2078_v15  ;;  %v514_v34 = vmul.f32 %v1561_v30, %v2078_v15  ;;  %v437_v35 = vpop.f32.mrb[3].mxu0  ;;  %v469_v36 = vpop.f32.mrb[3].mxu1 }
 0x138   : > { %v523_v38 = vadd.f32 %v2083_v19, %v503_v26  ;;  %v531_v39 = vadd.f32 %v2083_v19, %v511_v28  ;;  %v504_v40 = vmul.f32 %v2078_v15, %v437_v35  ;;  %v512_v41 = vmul.f32 %v2078_v15, %v469_v36 }
 0x139   : > { %v547_v42 = vmax.f32 %v525_v31, %v2088_v25  ;;  %v555_v43 = vmax.f32 %v533_v32, %v2088_v25  ;;  %v526_v44 = vadd.f32 %v2083_v19, %v506_v33  ;;  %v534_v45 = vadd.f32 %v2083_v19, %v514_v34 }
 0x13a   : > { %v545_v48 = vmax.f32 %v523_v38, %v2088_v25  ;;  %v553_v49 = vmax.f32 %v531_v39, %v2088_v25  ;;  %v524_v50 = vadd.f32 %v2083_v19, %v504_v40  ;;  %v532_v51 = vadd.f32 %v2083_v19, %v512_v41 }
 0x13b   : > { %v567_v52 = vmin.f32 %v547_v42, %v2099_v37  ;;  %v575_v53 = vmin.f32 %v555_v43, %v2099_v37  ;;  %v548_v56 = vmax.f32 %v526_v44, %v2088_v25  ;;  %v556_v57 = vmax.f32 %v534_v45, %v2088_v25 }
 0x13c   : > { %v565_v58 = vmin.f32 %v545_v48, %v2099_v37  ;;  %v573_v59 = vmin.f32 %v553_v49, %v2099_v37  ;;  %v546_v62 = vmax.f32 %v524_v50, %v2088_v25  ;;  %v554_v63 = vmax.f32 %v532_v51, %v2088_v25  ;;  %v2121_v0 = vpop.f32.mrb[4].mxu0  ;;  %v2123_v1 = vpop.f32.mrb[4].mxu1 }
 0x13d   : > { %v599_v2 = vsub.f32 %v567_v52, %v583_v46  ;;  %v607_v3 = vsub.f32 %v575_v53, %v591_v47  ;;  %v568_v4 = vmin.f32 %v548_v56, %v2099_v37  ;;  %v576_v5 = vmin.f32 %v556_v57, %v2099_v37  ;;  %v2127_v8 = vpop.f32.mrb[5].mxu0  ;;  %v2129_v9 = vpop.f32.mrb[5].mxu1 }
 0x13e   : > { %v597_v10 = vsub.f32 %v565_v58, %v581_v54  ;;  %v605_v11 = vsub.f32 %v573_v59, %v589_v55  ;;  %v566_v12 = vmin.f32 %v546_v62, %v2099_v37  ;;  %v574_v13 = vmin.f32 %v554_v63, %v2099_v37  ;;  %v2133_v14 = vpop.f32.mrb[6].mxu0  ;;  %v2135_v16 = vpop.f32.mrb[6].mxu1 }
 0x13f   : > { %v615_v17 = vmul.f32 0.5, %v599_v2  ;;  %v623_v18 = vmul.f32 0.5, %v607_v3  ;;  %v600_v20 = vsub.f32 %v568_v4, %v584_v60  ;;  %v608_v21 = vsub.f32 %v576_v5, %v592_v61  ;;  %v2137_v22 = vpop.f32.mrb[7].mxu0  ;;  %v2139_v23 = vpop.f32.mrb[7].mxu1 }
 0x140   : > { %v613_v24 = vmul.f32 0.5, %v597_v10  ;;  %v621_v26 = vmul.f32 0.5, %v605_v11  ;;  %v598_v28 = vsub.f32 %v566_v12, %v582_v6  ;;  %v606_v29 = vsub.f32 %v574_v13, %v590_v7 }
 0x141   : > { %v631_v30 = vadd.f32 %v615_v17, %v583_v46  ;;  %v639_v31 = vadd.f32 %v623_v18, %v591_v47  ;;  %v616_v32 = vmul.f32 0.5, %v600_v20  ;;  %v624_v33 = vmul.f32 0.5, %v608_v21 }
 0x142   : > { %v629_v34 = vadd.f32 %v613_v24, %v581_v54  ;;  %v637_v35 = vadd.f32 %v621_v26, %v589_v55  ;;  %v614_v36 = vmul.f32 0.5, %v598_v28  ;;  %v622_v38 = vmul.f32 0.5, %v606_v29 }
 0x143   : > { %vm647_vm4 = vcmp.ge.f32.partialorder %v631_v30, 1.0  ;;  %vm655_vm5 = vcmp.ge.f32.partialorder %v639_v31, 1.0  ;;  %v632_v39 = vadd.f32 %v616_v32, %v584_v60  ;;  %v640_v40 = vadd.f32 %v624_v33, %v592_v61 }
 0x144   : > { %v1834_v41 = vmov 0.0   ;;  %v679_v43 = vsel %vm647_vm4, 0.0, %v631_v30  ;;  %v687_v45 = vsel %vm655_vm5, 0.0, %v639_v31  ;;  %vm645_vm6 = vcmp.ge.f32.partialorder %v629_v34, 1.0 }
 0x145   : > { %v663_v42 = vsel %vm647_vm4, 1.0, %v1834_v41  ;;  %v671_v44 = vsel %vm655_vm5, 1.0, %v1834_v41  ;;  %696 = vst.msk [vmem:[#allocation2 + $0x10] sm:$0xff] %vm693_vm3, %v679_v43  ;;  %704 = vst.msk [vmem:[#allocation2 + $0x50] sm:$0xff] %vm693_vm3, %v687_v45  ;;  %vm653_vm7 = vcmp.ge.f32.partialorder %v637_v35, 1.0  ;;  %vm648_vm8 = vcmp.ge.f32.partialorder %v632_v39, 1.0 }
 0x146   : > { %vm656_vm9 = vcmp.ge.f32.partialorder %v640_v40, 1.0  ;;  %v661_v46 = vsel %vm645_vm6, 1.0, %v1834_v41  ;;  %v677_v47 = vsel %vm645_vm6, 0.0, %v629_v34  ;;  %v669_v48 = vsel %vm653_vm7, 1.0, %v1834_v41 }
 0x147   : > { %v685_v49 = vsel %vm653_vm7, 0.0, %v637_v35  ;;  %694 = vst.msk [vmem:[#allocation2] sm:$0xff] %vm693_vm3, %v677_v47  ;;  %v710_v50 = vmax.f32 %v661_v46, %v663_v42  ;;  %v714_v51 = vmax.f32 %v669_v48, %v671_v44  ;;  %v680_v52 = vsel %vm648_vm8, 0.0, %v632_v39 }
 0x148   : > { %702 = vst.msk [vmem:[#allocation2 + $0x40] sm:$0xff] %vm693_vm3, %v685_v49  ;;  %697 = vst.msk [vmem:[#allocation2 + $0x18] sm:$0xff] %vm693_vm3, %v680_v52  ;;  %v688_v53 = vsel %vm656_vm9, 0.0, %v640_v40  ;;  %v630_v54 = vadd.f32 %v614_v36, %v582_v6  ;;  %v2152_v55 = vadd.f32 %v622_v38, %v590_v7  ;;  %v664_v60 = vsel %vm648_vm8, 1.0, %v1834_v41 }
 0x149   : > { %v726_v56 = vcombine.high %v710_v50, %v710_v50  ;;  %v733_v57 = vrot.slane %v710_v50, %v2091_v27  ;;  %v794_v58 = vcombine.high %v714_v51, %v714_v51  ;;  %v801_v59 = vrot.slane %v714_v51, %v2091_v27  ;;  %705 = vst.msk [vmem:[#allocation2 + $0x58] sm:$0xff] %vm693_vm3, %v688_v53 }
 0x14a   : > { %v2161_v61 = vsel %vm656_vm9, 1.0, %v1834_v41  ;;  %vm646_vm10 = vcmp.ge.f32.partialorder %v630_v54, 1.0  ;;  %vm654_vm12 = vcmp.ge.f32.partialorder %v2152_v55, 1.0  ;;  %v509_v42 = vmul.f32 %v2121_v0, %v2078_v15 }
 0x14b   : > { %v740_v62 = vrot.slane %v726_v56, %v2091_v27  ;;  %v741_v63 = vcombine.high %v733_v57, %v733_v57  ;;  %v1432_v2 = vrot.slane %v733_v57, 9  ;;  %v808_v3 = vrot.slane %v794_v58, %v2091_v27 }
 0x14c   : > { %v809_v4 = vcombine.high %v801_v59, %v801_v59  ;;  %v1448_v5 = vrot.slane %v801_v59, 9  ;;  %v678_v6 = vsel %vm646_vm10, 0.0, %v630_v54  ;;  %v662_v28 = vsel %vm646_vm10, 1.0, %v1834_v41 }
 0x14d   : > { %v742_v7 = vcombine.high %v740_v62, %v740_v62  ;;  %v1433_v10 = vrot.slane %v741_v63, 9  ;;  %v1434_v11 = vrot.slane %v740_v62, 9  ;;  %v990_v12 = vmax.f32 %v733_v57, %v1432_v2  ;;  %695 = vst.msk [vmem:[#allocation2 + $0x8] sm:$0xff] %vm693_vm3, %v678_v6 }
 0x14e   : > { %v810_v13 = vcombine.high %v808_v3, %v808_v3  ;;  %v1449_v17 = vrot.slane %v809_v4, 9  ;;  %v1450_v18 = vrot.slane %v808_v3, 9  ;;  %v1006_v20 = vmax.f32 %v801_v59, %v1448_v5 }
 0x14f   : > { %v1435_v21 = vrot.slane %v742_v7, 9  ;;  %v991_v24 = vmax.f32 %v741_v63, %v1433_v10  ;;  %v992_v26 = vmax.f32 %v740_v62, %v1434_v11  ;;  %v1504_v29 = vpack.c.bf16 %v990_v12, %v990_v12 }
 0x150   : > { %v1451_v30 = vrot.slane %v810_v13, 9  ;;  %v1007_v31 = vmax.f32 %v809_v4, %v1449_v17  ;;  %v1008_v32 = vmax.f32 %v808_v3, %v1450_v18  ;;  %v1520_v36 = vpack.c.bf16 %v1006_v20, %v1006_v20 }
 0x151   : > { %v993_v33 = vmax.f32 %v742_v7, %v1435_v21  ;;  %v1505_v34 = vpack.c.bf16 %v991_v24, %v991_v24  ;;  %v1506_v35 = vpack.c.bf16 %v992_v26, %v992_v26  ;;  %v711_v46 = vmax.f32 %v662_v28, %v664_v60 }
 0x152   : > { %v1009_v38 = vmax.f32 %v810_v13, %v1451_v30  ;;  %v1521_v39 = vpack.c.bf16 %v1007_v31, %v1007_v31  ;;  %v1522_v40 = vpack.c.bf16 %v1008_v32, %v1008_v32  ;;  %v1150_v47 = vunpack.c.l.b16 %v1504_v29 }
 0x153   : > { %v1507_v43 = vpack.c.bf16 %v993_v33, %v993_v33  ;;  %v1151_v44 = vunpack.c.l.b16 %v1505_v34  ;;  %v1152_v45 = vunpack.c.l.b16 %v1506_v35  ;;  %v1166_v53 = vunpack.c.l.b16 %v1520_v36 }
 0x154   : > { %v1523_v48 = vpack.c.bf16 %v1009_v38, %v1009_v38  ;;  %v1167_v49 = vunpack.c.l.b16 %v1521_v39  ;;  %v1168_v50 = vunpack.c.l.b16 %v1522_v40  ;;  %v743_v54 = vcombine.high %v711_v46, %v711_v46 }
 0x155   : > { %v1153_v51 = vunpack.c.l.b16 %v1507_v43  ;;  %v1182_v52 = vrot.slane %v1151_v44, 7  ;;  %v1185_v56 = vrot.slane %v1152_v45, 6  ;;  %v750_v59 = vrot.slane %v711_v46, %v2091_v27 }
 0x156   : > { %v1169_v57 = vunpack.c.l.b16 %v1523_v48  ;;  %v1217_v58 = vrot.slane %v1167_v49, 7  ;;  %v757_v62 = vrot.slane %v743_v54, %v2091_v27  ;;  %v670_v60 = vsel %vm654_vm12, 1.0, %v1834_v41 }
 0x157   : > { %v1184_v0 = vsel %vm1183_vm11, %v1182_v52, %v1150_v47  ;;  %v686_v63 = vsel %vm654_vm12, 0.0, %v2152_v55  ;;  %v1188_v2 = vrot.slane %v1153_v51, 5  ;;  %v1219_v3 = vrot.slane %v1168_v50, 6  ;;  %v587_v47 = vld [vmem:[#allocation2 + $0x30] sm:$0xff] }
 0x158   : > { %v758_v4 = vcombine.high %v750_v59, %v750_v59  ;;  %703 = vst.msk [vmem:[#allocation2 + $0x48] sm:$0xff] %vm693_vm3, %v686_v63  ;;  %v517_v5 = vmul.f32 %v2123_v1, %v2078_v15  ;;  %v1218_v6 = vsel %vm1183_vm11, %v1217_v58, %v1166_v53  ;;  %v759_v7 = vcombine.high %v757_v62, %v757_v62 }
 0x159   : > { %v1436_v10 = vrot.slane %v750_v59, 9  ;;  %v1438_v11 = vrot.slane %v757_v62, 9  ;;  %v1187_v12 = vsel %vm1186_vm13, %v1185_v56, %v1184_v0  ;;  %v1221_v13 = vrot.slane %v1169_v57, 5 }
 0x15a   : > { %v1437_v17 = vrot.slane %v758_v4, 9  ;;  %v715_v55 = vmax.f32 %v670_v60, %v2161_v61  ;;  %v1439_v18 = vrot.slane %v759_v7, 9  ;;  %v529_v24 = vadd.f32 %v2083_v19, %v509_v42 }
 0x15b   : > { %v994_v20 = vmax.f32 %v750_v59, %v1436_v10  ;;  %v996_v21 = vmax.f32 %v757_v62, %v1438_v11  ;;  %v1220_v26 = vsel %vm1186_vm13, %v1219_v3, %v1218_v6  ;;  %v537_v42 = vadd.f32 %v2083_v19, %v517_v5 }
 0x15c   : > { %v995_v28 = vmax.f32 %v758_v4, %v1437_v17  ;;  %v811_v1 = vcombine.high %v715_v55, %v715_v55  ;;  %v818_v29 = vrot.slane %v715_v55, %v2091_v27  ;;  %v997_v30 = vmax.f32 %v759_v7, %v1439_v18 }
 0x15d   : > { %v1508_v31 = vpack.c.bf16 %v994_v20, %v994_v20  ;;  %v1510_v32 = vpack.c.bf16 %v996_v21, %v996_v21  ;;  %v551_v33 = vmax.f32 %v529_v24, %v2088_v25  ;;  %v1190_v44 = vsel %vm1189_vm14, %v1188_v2, %v1187_v12  ;;  %v595_v2 = vld [vmem:[#allocation2 + $0x70] sm:$0xff] }
 0x15e   : > { %v1509_v34 = vpack.c.bf16 %v995_v28, %v995_v28  ;;  %v825_v35 = vrot.slane %v811_v1, %v2091_v27  ;;  %v826_v61 = vcombine.high %v818_v29, %v818_v29  ;;  %v1452_v36 = vrot.slane %v818_v29, 9  ;;  %v585_v1 = vld [vmem:[#allocation2 + $0x20] sm:$0xff] }
 0x15f   : > { %v1511_v38 = vpack.c.bf16 %v997_v30, %v997_v30  ;;  %v1154_v39 = vunpack.c.l.b16 %v1508_v31  ;;  %v571_v40 = vmin.f32 %v551_v33, %v2099_v37  ;;  %v2194_v43 = vunpack.c.l.b16 %v1510_v32  ;;  %v593_v33 = vld [vmem:[#allocation2 + $0x60] sm:$0xff] }
 0x160   : > { %v1453_v45 = vrot.slane %v826_v61, 9  ;;  %v1454_v46 = vrot.slane %v825_v35, 9  ;;  %v1155_v48 = vunpack.c.l.b16 %v1509_v34  ;;  %v1010_v50 = vmax.f32 %v818_v29, %v1452_v36 }
 0x161   : > { %v1191_v49 = vrot.slane %v1154_v39, 4  ;;  %v1222_v51 = vsel %vm1189_vm14, %v1221_v13, %v1220_v26  ;;  %v2198_v52 = vunpack.c.l.b16 %v1511_v38  ;;  %v2200_v53 = vcombine.high %v825_v35, %v825_v35 }
 0x162   : > { %v1011_v54 = vmax.f32 %v826_v61, %v1453_v45  ;;  %v1012_v56 = vmax.f32 %v825_v35, %v1454_v46  ;;  %v1524_v58 = vpack.c.bf16 %v1010_v50, %v1010_v50  ;;  %v603_v59 = vsub.f32 %v571_v40, %v587_v47 }
 0x163   : > { %v1193_v57 = vsel %vm1192_vm15, %v1191_v49, %v1190_v44  ;;  %v559_v0 = vmax.f32 %v537_v42, %v2088_v25  ;;  %v1197_v62 = vrot.slane %v2194_v43, 2  ;;  %v507_v3 = vmul.f32 %v2078_v15, %v2127_v8  ;;  %v588_v49 = vld [vmem:[#allocation2 + $0x38] sm:$0xff] }
 0x164   : > { %v1525_v60 = vpack.c.bf16 %v1011_v54, %v1011_v54  ;;  %v1526_v63 = vpack.c.bf16 %v1012_v56, %v1012_v56  ;;  %v1170_v4 = vunpack.c.l.b16 %v1524_v58  ;;  %v619_v5 = vmul.f32 0.5, %v603_v59  ;;  %v596_v56 = vld [vmem:[#allocation2 + $0x78] sm:$0xff] }
 0x165   : > { %v579_v6 = vmin.f32 %v559_v0, %v2099_v37  ;;  %v515_v7 = vmul.f32 %v2078_v15, %v2129_v9  ;;  %v1194_v10 = vrot.slane %v1155_v48, 3  ;;  %v527_v13 = vadd.f32 %v2083_v19, %v507_v3 }
 0x166   : > { %v1171_v11 = vunpack.c.l.b16 %v1525_v60  ;;  %v2210_v12 = vunpack.c.l.b16 %v1526_v63  ;;  %v1223_v17 = vrot.slane %v1170_v4, 4  ;;  %v635_v55 = vadd.f32 %v619_v5, %v587_v47 }
 0x167   : > { %v611_v18 = vsub.f32 %v579_v6, %v595_v2  ;;  %v535_v20 = vadd.f32 %v2083_v19, %v515_v7  ;;  %v1455_v8 = vrot.slane %v2200_v53, 9  ;;  %v549_v9 = vmax.f32 %v527_v13, %v2088_v25 }
 0x168   : > { %v1225_v21 = vrot.slane %v1171_v11, 3  ;;  %v1227_v24 = vrot.slane %v2210_v12, 2  ;;  %v1224_v26 = vsel %vm1192_vm15, %v1223_v17, %v1222_v51  ;;  %vm651_vm4 = vcmp.ge.f32.partialorder %v635_v55, 1.0 }
 0x169   : > { %v627_v28 = vmul.f32 0.5, %v611_v18  ;;  %v557_v29 = vmax.f32 %v535_v20, %v2088_v25  ;;  %v667_v30 = vsel %vm651_vm4, 1.0, %v1834_v41  ;;  %v683_v31 = vsel %vm651_vm4, 0.0, %v635_v55 }
 0x16a   : > { %v569_v32 = vmin.f32 %v549_v9, %v2099_v37  ;;  %v510_v34 = vmul.f32 %v2133_v14, %v2078_v15  ;;  %700 = vst.msk [vmem:[#allocation2 + $0x30] sm:$0xff] %vm693_vm3, %v683_v31  ;;  %v518_v36 = vmul.f32 %v2135_v16, %v2078_v15  ;;  %v508_v38 = vmul.f32 %v2078_v15, %v2137_v22 }
 0x16b   : > { %v643_v35 = vadd.f32 %v627_v28, %v595_v2  ;;  %v577_v61 = vmin.f32 %v557_v29, %v2099_v37  ;;  %v516_v42 = vmul.f32 %v2078_v15, %v2139_v23  ;;  %v1196_v43 = vsel %vm1195_vm0, %v1194_v10, %v1193_v57 }
 0x16c   : > { %v601_v39 = vsub.f32 %v569_v32, %v585_v1  ;;  %v530_v40 = vadd.f32 %v2083_v19, %v510_v34  ;;  %v538_v44 = vadd.f32 %v2083_v19, %v518_v36  ;;  %v528_v45 = vadd.f32 %v2083_v19, %v508_v38 }
 0x16d   : > { %vm659_vm5 = vcmp.ge.f32.partialorder %v643_v35, 1.0  ;;  %v609_v14 = vsub.f32 %v577_v61, %v593_v33  ;;  %v536_v50 = vadd.f32 %v2083_v19, %v516_v42  ;;  %v1199_v57 = vsel %vm1198_vm1, %v1197_v62, %v1196_v43 }
 0x16e   : > { %v675_v46 = vsel %vm659_vm5, 1.0, %v1834_v41  ;;  %v691_v16 = vsel %vm659_vm5, 0.0, %v643_v35  ;;  %v617_v47 = vmul.f32 0.5, %v601_v39  ;;  %v552_v22 = vmax.f32 %v530_v40, %v2088_v25 }
 0x16f   : > { %708 = vst.msk [vmem:[#allocation2 + $0x70] sm:$0xff] %vm693_vm3, %v691_v16  ;;  %v625_v48 = vmul.f32 0.5, %v609_v14  ;;  %v560_v15 = vmax.f32 %v538_v44, %v2088_v25  ;;  %v550_v23 = vmax.f32 %v528_v45, %v2088_v25  ;;  %v1200_v58 = vrot.slane %v2198_v52, 1 }
 0x170   : > { %v633_v51 = vadd.f32 %v617_v47, %v585_v1  ;;  %v572_v54 = vmin.f32 %v552_v22, %v2099_v37  ;;  %v558_v63 = vmax.f32 %v536_v50, %v2088_v25  ;;  %v1226_v19 = vsel %vm1195_vm0, %v1225_v21, %v1224_v26  ;;  %v586_v26 = vld [vmem:[#allocation2 + $0x28] sm:$0xff] }
 0x171   : > { %v641_v59 = vadd.f32 %v625_v48, %v593_v33  ;;  %v580_v0 = vmin.f32 %v560_v15, %v2099_v37  ;;  %v570_v60 = vmin.f32 %v550_v23, %v2099_v37  ;;  %v2248_v3 = vsel %vm1201_vm2, %v1200_v58, %v1199_v57 }
 0x172   : > { %vm649_vm6 = vcmp.ge.f32.partialorder %v633_v51, 1.0  ;;  %v604_v2 = vsub.f32 %v572_v54, %v588_v49  ;;  %v1013_v25 = vmax.f32 %v2200_v53, %v1455_v8  ;;  %v2257_v13 = vmin.f32 %v558_v63, %v2099_v37  ;;  %v594_v54 = vld [vmem:[#allocation2 + $0x68] sm:$0xff] }
 0x173   : > { %v665_v4 = vsel %vm649_vm6, 1.0, %v1834_v41  ;;  %v681_v5 = vsel %vm649_vm6, 0.0, %v633_v51  ;;  %vm657_vm7 = vcmp.ge.f32.partialorder %v641_v59, 1.0  ;;  %v612_v62 = vsub.f32 %v580_v0, %v596_v56 }
 0x174   : > { %698 = vst.msk [vmem:[#allocation2 + $0x20] sm:$0xff] %vm693_vm3, %v681_v5  ;;  %v712_v52 = vmax.f32 %v665_v4, %v667_v30  ;;  %v673_v6 = vsel %vm657_vm7, 1.0, %v1834_v41  ;;  %v689_v7 = vsel %vm657_vm7, 0.0, %v641_v59  ;;  %v620_v10 = vmul.f32 0.5, %v604_v2 }
 0x175   : > { %706 = vst.msk [vmem:[#allocation2 + $0x60] sm:$0xff] %vm693_vm3, %v689_v7  ;;  %v716_v11 = vmax.f32 %v673_v6, %v675_v46  ;;  %v2263_v18 = vsel %vm1198_vm1, %v1227_v24, %v1226_v19  ;;  %v628_v9 = vmul.f32 0.5, %v612_v62  ;;  %v1527_v37 = vpack.c.bf16 %v1013_v25, %v1013_v25 }
 0x176   : > { %v760_v17 = vcombine.high %v712_v52, %v712_v52  ;;  %v767_v55 = vrot.slane %v712_v52, %v2091_v27  ;;  %v636_v1 = vadd.f32 %v620_v10, %v588_v49  ;;  %v602_v24 = vsub.f32 %v570_v60, %v586_v26 }
 0x177   : > { %v828_v20 = vcombine.high %v716_v11, %v716_v11  ;;  %v835_v21 = vrot.slane %v716_v11, %v2091_v27  ;;  %v644_v36 = vadd.f32 %v628_v9, %v596_v56  ;;  %v1173_v16 = vunpack.c.l.b16 %v1527_v37 }
 0x178   : > { %v774_v53 = vrot.slane %v760_v17, %v2091_v27  ;;  %v775_v8 = vcombine.high %v767_v55, %v767_v55  ;;  %v1440_v28 = vrot.slane %v767_v55, 9  ;;  %vm652_vm8 = vcmp.ge.f32.partialorder %v636_v1, 1.0 }
 0x179   : > { %v842_v29 = vrot.slane %v828_v20, %v2091_v27  ;;  %v843_v30 = vcombine.high %v835_v21, %v835_v21  ;;  %v1456_v31 = vrot.slane %v835_v21, 9  ;;  %v684_v49 = vsel %vm652_vm8, 0.0, %v636_v1 }
 0x17a   : > { %v776_v32 = vcombine.high %v774_v53, %v774_v53  ;;  %v1441_v12 = vrot.slane %v775_v8, 9  ;;  %v1442_v33 = vrot.slane %v774_v53, 9  ;;  %v998_v38 = vmax.f32 %v767_v55, %v1440_v28  ;;  %701 = vst.msk [vmem:[#allocation2 + $0x38] sm:$0xff] %vm693_vm3, %v684_v49 }
 0x17b   : > { %v844_v34 = vcombine.high %v842_v29, %v842_v29  ;;  %v1457_v35 = vrot.slane %v843_v30, 9  ;;  %v1458_v61 = vrot.slane %v842_v29, 9  ;;  %v1014_v40 = vmax.f32 %v835_v21, %v1456_v31 }
 0x17c   : > { %v999_v39 = vmax.f32 %v775_v8, %v1441_v12  ;;  %v1443_v42 = vrot.slane %v776_v32, 9  ;;  %v1000_v43 = vmax.f32 %v774_v53, %v1442_v33  ;;  %v1512_v22 = vpack.c.bf16 %v998_v38, %v998_v38 }
 0x17d   : > { %v1459_v14 = vrot.slane %v844_v34, 9  ;;  %v1015_v44 = vmax.f32 %v843_v30, %v1457_v35  ;;  %v1016_v46 = vmax.f32 %v842_v29, %v1458_v61  ;;  %v1528_v48 = vpack.c.bf16 %v1014_v40, %v1014_v40 }
 0x17e   : > { %v1513_v45 = vpack.c.bf16 %v999_v39, %v999_v39  ;;  %v618_v15 = vmul.f32 0.5, %v602_v24  ;;  %v1001_v23 = vmax.f32 %v776_v32, %v1443_v42  ;;  %v1514_v50 = vpack.c.bf16 %v1000_v43, %v1000_v43 }
 0x17f   : > { %v1529_v47 = vpack.c.bf16 %v1015_v44, %v1015_v44  ;;  %v1017_v51 = vmax.f32 %v844_v34, %v1459_v14  ;;  %vm660_vm9 = vcmp.ge.f32.partialorder %v644_v36, 1.0  ;;  %v1530_v57 = vpack.c.bf16 %v1016_v46, %v1016_v46 }
 0x180   : > { %v1159_v56 = vunpack.c.l.b16 %v1513_v45  ;;  %v668_v59 = vsel %vm652_vm8, 1.0, %v1834_v41  ;;  %v692_v0 = vsel %vm660_vm9, 0.0, %v644_v36  ;;  %vm1253_vm10 = vcmask 125952  }
 0x181   : > { %v1175_v58 = vunpack.c.l.b16 %v1529_v47  ;;  %v1158_v60 = vunpack.c.l.b16 %v1512_v22  ;;  %v1174_v63 = vunpack.c.l.b16 %v1528_v48  ;;  %709 = vst.msk [vmem:[#allocation2 + $0x78] sm:$0xff] %vm693_vm3, %v692_v0  ;;  %v634_v2 = vadd.f32 %v618_v15, %v586_v26 }
 0x182   : > { %v610_v19 = vsub.f32 %v2257_v13, %v594_v54  ;;  %v1515_v4 = vpack.c.bf16 %v1001_v23, %v1001_v23  ;;  %v1160_v5 = vunpack.c.l.b16 %v1514_v50  ;;  %v1531_v62 = vpack.c.bf16 %v1017_v51, %v1017_v51 }
 0x183   : > { %v1229_v52 = vrot.slane %v1173_v16, 1  ;;  %v1203_v6 = vrot.slane %v1159_v56, 7  ;;  %v1176_v7 = vunpack.c.l.b16 %v1530_v57  ;;  %vm650_vm12 = vcmp.ge.f32.partialorder %v634_v2, 1.0 }
 0x184   : > { %v626_v10 = vmul.f32 0.5, %v610_v19  ;;  %v1231_v25 = vrot.slane %v1175_v58, 7  ;;  %v666_v11 = vsel %vm650_vm12, 1.0, %v1834_v41  ;;  %v682_v17 = vsel %vm650_vm12, 0.0, %v634_v2 }
 0x185   : > { %v1230_v55 = vsel %vm1201_vm2, %v1229_v52, %v2263_v18  ;;  %699 = vst.msk [vmem:[#allocation2 + $0x28] sm:$0xff] %vm693_vm3, %v682_v17  ;;  %v713_v13 = vmax.f32 %v666_v11, %v668_v59  ;;  %v1245_v21 = vpack.c.b16 %v2248_v3, %v2248_v3  ;;  %v1161_v26 = vunpack.c.l.b16 %v1515_v4 }
 0x186   : > { %v642_v20 = vadd.f32 %v626_v10, %v594_v54  ;;  %v1247_v9 = vpack.c.b16 %v1230_v55, %v1230_v55  ;;  %v1205_v53 = vrot.slane %v1160_v5, 6  ;;  %v2281_v8 = vunpack.c.l.b16 %v1531_v62 }
 0x187   : > { %v676_v28 = vsel %vm660_vm9, 1.0, %v1834_v41  ;;  %v1204_v1 = vsel %vm1183_vm11, %v1203_v6, %v1158_v60  ;;  %v777_v37 = vcombine.high %v713_v13, %v713_v13  ;;  %v784_v18 = vrot.slane %v713_v13, %v2091_v27  ;;  %1254 = vst.msk [vmem:[%s2034_s8] sm:$0xf] %vm1253_vm10, %v1245_v21 }
 0x188   : > { %vm658_vm4 = vcmp.ge.f32.partialorder %v642_v20, 1.0  ;;  %1256 = vst.msk [vmem:[%s2034_s8 + $0x8] sm:$0xf] %vm1253_vm10, %v1247_v9  ;;  %v1232_v3 = vsel %vm1183_vm11, %v1231_v25, %v1174_v63  ;;  %v1233_v29 = vrot.slane %v1176_v7, 6  ;;  %v1206_v34 = vsel %vm1186_vm13, %v1205_v53, %v1204_v1 }
 0x189   : > { %v674_v30 = vsel %vm658_vm4, 1.0, %v1834_v41  ;;  %v690_v31 = vsel %vm658_vm4, 0.0, %v642_v20  ;;  %v791_v32 = vrot.slane %v777_v37, %v2091_v27  ;;  %v792_v12 = vcombine.high %v784_v18, %v784_v18 }
 0x18a   : > { %v1444_v33 = vrot.slane %v784_v18, 9  ;;  %707 = vst.msk [vmem:[#allocation2 + $0x68] sm:$0xff] %vm693_vm3, %v690_v31  ;;  %v717_v24 = vmax.f32 %v674_v30, %v676_v28  ;;  %v1207_v35 = vrot.slane %v1161_v26, 5  ;;  %v1234_v40 = vsel %vm1186_vm13, %v1233_v29, %v1232_v3 }
 0x18b   : > { %v793_v61 = vcombine.high %v791_v32, %v791_v32  ;;  %v1445_v36 = vrot.slane %v792_v12, 9  ;;  %v1446_v38 = vrot.slane %v791_v32, 9  ;;  %v1235_v42 = vrot.slane %v2281_v8, 5 }
 0x18c   : > { %v1002_v39 = vmax.f32 %v784_v18, %v1444_v33  ;;  %v845_v41 = vcombine.high %v717_v24, %v717_v24  ;;  %v852_v43 = vrot.slane %v717_v24, %v2091_v27  ;;  %v1208_v16 = vsel %vm1189_vm14, %v1207_v35, %v1206_v34 }
 0x18d   : > { %v1447_v14 = vrot.slane %v793_v61, 9  ;;  %v1003_v44 = vmax.f32 %v792_v12, %v1445_v36  ;;  %v1004_v45 = vmax.f32 %v791_v32, %v1446_v38  ;;  %v1236_v11 = vsel %vm1189_vm14, %v1235_v42, %v1234_v40 }
 0x18e   : > { %v1516_v46 = vpack.c.bf16 %v1002_v39, %v1002_v39  ;;  %v859_v47 = vrot.slane %v845_v41, %v2091_v27  ;;  %v860_v22 = vcombine.high %v852_v43, %v852_v43  ;;  %v1460_v48 = vrot.slane %v852_v43, 9 }
 0x18f   : > { %v1005_v49 = vmax.f32 %v793_v61, %v1447_v14  ;;  %v1517_v15 = vpack.c.bf16 %v1003_v44, %v1003_v44  ;;  %v1518_v23 = vpack.c.bf16 %v1004_v45, %v1004_v45 }
 0x190   : > { %v1162_v50 = vunpack.c.l.b16 %v1516_v46  ;;  %v861_v51 = vcombine.high %v859_v47, %v859_v47  ;;  %v1461_v54 = vrot.slane %v860_v22, 9  ;;  %v1462_v56 = vrot.slane %v859_v47, 9 }
 0x191   : > { %v1018_v57 = vmax.f32 %v852_v43, %v1460_v48  ;;  %v1519_v58 = vpack.c.bf16 %v1005_v49, %v1005_v49  ;;  %v1163_v59 = vunpack.c.l.b16 %v1517_v15  ;;  %v1164_v0 = vunpack.c.l.b16 %v1518_v23 }
 0x192   : > { %v1209_v60 = vrot.slane %v1162_v50, 4  ;;  %v1463_v63 = vrot.slane %v861_v51, 9  ;;  %v1019_v2 = vmax.f32 %v860_v22, %v1461_v54  ;;  %v1020_v27 = vmax.f32 %v859_v47, %v1462_v56 }
 0x193   : > { %v1532_v19 = vpack.c.bf16 %v1018_v57, %v1018_v57  ;;  %v1165_v4 = vunpack.c.l.b16 %v1519_v58  ;;  %v1211_v62 = vrot.slane %v1163_v59, 3  ;;  %v1213_v25 = vrot.slane %v1164_v0, 2 }
 0x194   : > { %v1210_v5 = vsel %vm1192_vm15, %v1209_v60, %v1208_v16  ;;  %v1021_v52 = vmax.f32 %v861_v51, %v1463_v63  ;;  %v1533_v6 = vpack.c.bf16 %v1019_v2, %v1019_v2  ;;  %v1534_v7 = vpack.c.bf16 %v1020_v27, %v1020_v27 }
 0x195   : > { %v1178_v10 = vunpack.c.l.b16 %v1532_v19  ;;  %v1212_v17 = vsel %vm1195_vm0, %v1211_v62, %v1210_v5  ;;  %v1215_v26 = vrot.slane %v1165_v4, 1 }
 0x196   : > { %v1535_v55 = vpack.c.bf16 %v1021_v52, %v1021_v52  ;;  %v1179_v13 = vunpack.c.l.b16 %v1533_v6  ;;  %v1180_v20 = vunpack.c.l.b16 %v1534_v7  ;;  %v1214_v9 = vsel %vm1198_vm1, %v1213_v25, %v1212_v17 }
 0x197   : > { %v1237_v21 = vrot.slane %v1178_v10, 4  ;;  %v1216_v37 = vsel %vm1201_vm2, %v1215_v26, %v1214_v9 }
 0x198   : > { %v1181_v53 = vunpack.c.l.b16 %v1535_v55  ;;  %v1239_v28 = vrot.slane %v1179_v13, 3  ;;  %v1241_v1 = vrot.slane %v1180_v20, 2  ;;  %v1246_v29 = vpack.c.b16 %v1216_v37, %v1216_v37 }
 0x199   : > { %v1238_v8 = vsel %vm1192_vm15, %v1237_v21, %v1236_v11 }
 0x19a   : > { %v1240_v18 = vsel %vm1195_vm0, %v1239_v28, %v1238_v8  ;;  %v1243_v3 = vrot.slane %v1181_v53, 1  ;;  %1255 = vst.msk [vmem:[%s2034_s8 + $0x4] sm:$0xf] %vm1253_vm10, %v1246_v29 }
 0x19b   : > { %v1242_v30 = vsel %vm1198_vm1, %v1241_v1, %v1240_v18 }
 0x19c   : > { %v1244_v31 = vsel %vm1201_vm2, %v1243_v3, %v1242_v30 }
 0x19d   : > { %v1248_v32 = vpack.c.b16 %v1244_v31, %v1244_v31 }
 0x19f   : > { %1257 = vst.msk [vmem:[%s2034_s8 + $0xc] sm:$0xf] %vm1253_vm10, %v1248_v32 }
 0x1a0   : > { %1726 = shalt.err (!%p1723_p9)
}
 0x1a1   : > { %s1727_s8 = scalar_lea.hbm %s2319_s2, 256  ;;  %s1731_s9 = scalar_lea.hbm %s2414_s7, 4096 }
 0x1a2   : > { %p1728_p3 = scmp.ne.s32.totalorder %s2319_s2, %s1727_s8  ;;  %p1732_p11 = scmp.lt.u32.totalorder %s2319_s2, %s2414_s7 }
 0x1a3   : > { %p1733_p12 = scmp.lt.u32.totalorder %s1731_s9, %s1727_s8  ;;  %p1735_p1 = scmp.lt.u32.totalorder %s1727_s8, %s2319_s2 }
 0x1a4   : > { %p1729_p5 = pnand %p1728_p3, %p2415_p13 }
 0x1a5   : > { %p1734_p7 = por %p1733_p12, %p1732_p11 }
 0x1a6   : > { %p1730_p10 = pneg %p1729_p5 }
 0x1a7   : > { %p1736_p0 = por %p1735_p1, %p1734_p7 }
 0x1a9   : > { %p1737_p2 = pnand %p1736_p0, %p1730_p10 }
 0x1ab   : > { %1740 = shalt.err (!%p1737_p2)
}
 0x1ac   : > { %s1836_s13 = smov 64   ;;  %s1837_s25 = smov 4  }
 0x1ad   : > { %1574 = dma.vmem_to_hbm [thread:$0]  (%p2415_p13), %s2321_s14, 256, %s2319_s2, %s1259_s15, %s1836_s13, %s1836_s13, %s1837_s25  }
 0x1ae PF: > { %s2416_s26 = sld [smem:[#allocation9_spill]]  ;;  %p1585_p4 = scmp.ge.s32.totalorder %s1827_s24, 2 }
 0x1af   : > { %p2417_p6 = scmp.ne.s32.totalorder %s2408_s10, 0 }
 0x1b1   : > { %p1581_p8 = pnand %p1585_p4, %p2417_p6 }
 0x1b4   : > { %s1291_s19 = sand.u32 1, %s2416_s26  }
 0x1b5   : > { %s1292_s30 = scalar_lea.sflag [#allocation5], %s1291_s19 }
 0x1b6   : > { %1786 = dma.done.wait (!%p1581_p8), %s1292_s30, 256  }
 0x1b7   : > { %1788 = vsyncadd (!%p1581_p8), %s1292_s30, 4294967040  ;;  %s20_s24 = sadd.s32 1, %s1827_s24   ;;  %s2418_s11 = sld [smem:[#allocation11_spill]] }
 0x1b8   : > { %p17_p9 = scmp.ge.s32.totalorder %s20_s24, 18   ;;  %s2419_s14 = sld [smem:[#allocation12_spill]] }
 0x1b9   : > { %s2420_s2 = sld [smem:[#allocation13_spill]]  ;;  %s2421_s15 = smov %s1795_s16 }
 0x1ba   : > { %s2422_s16 = smov %s1799_s17  ;;  %s2423_s17 = smov %s1964_s28 }
 0x1bb   : > { %s2424_s18 = smov %s1815_s21  ;;  %s2425_s19 = smov %s1819_s22 }
 0x1bc   : > { %s2426_s20 = smov %s1823_s23  ;;  %19 = sbr.rel (!%p17_p9) target bundleno = 11 (0xb), region = 88 }
 0x1bd   : > { %s2427_s21 = smov %s2418_s11 }
 0x1be   : > { %s2428_s22 = smov %s2419_s14 }
 0x1bf   : > { %s2429_s23 = smov %s2420_s2 }
 0x1c3   :  { %1297 = vsyncpa [#allocation4], 1 }
 0x1c4   :  { %1299 = vsyncpa [#allocation4 + $0x1], 1 }
 0x1c5   :  { %1300 = vsyncpa [#allocation5], 1 }
 0x1c6   :  { %1302 = vsyncpa [#allocation5 + $0x1], 1 }

</bundles_post_ra>
